<compile_context>
chip_gen: v6e
topology: v6e:2x2x1
jax: 0.10.0
libtpu: 0.0.40
codegen_flags: <defaults>
</compile_context>

<pallas_src>
import functools

import jax
import jax.numpy as jnp
import numpy as np
from jax.experimental import pallas as pl
from jax.experimental.pallas import tpu as pltpu


def _binary_conv3x3_kernel(x_ref, w_ref, b_ref, o_ref, *, TH, W, Cin):
    """One (batch, row-tile) step.

    x_ref : (1, H+2, W+2, Cin)   zero-padded, pre-binarized input (bf16/f32)
    w_ref : (9*Cin, Cout_pad)    fused, pre-binarized weight (bf16/f32)
    b_ref : (1, Cout_pad)        bias (f32, zero-padded)
    o_ref : (1, TH*W, Cout_pad)  lane-dense output tile (f32)
    """
    t = pl.program_id(1)
    row0 = pl.multiple_of(t * TH, TH)
    # (TH+2, W+2, Cin) slab for this row tile (dynamic slice on the leading,
    # untiled axis is cheap).
    x = x_ref[0, pl.ds(row0, TH + 2)]

    # im2col: 9 shifted patches concatenated along the channel/lane axis.
    cols = []
    for dy in range(3):
        for dx in range(3):
            cols.append(x[dy:dy + TH, dx:dx + W, :].reshape(TH * W, Cin))
    patches = jnp.concatenate(cols, axis=1)            # (TH*W, 9*Cin)

    # Single well-shaped MXU matmul, f32 accumulation (exact for +-1 operands).
    acc = jnp.dot(patches, w_ref[...], preferred_element_type=jnp.float32)
    o_ref[0] = acc + b_ref[...]


def _pick_row_tile(H, W):
    """Largest divisor TH of H with TH*W <= 128 rows and sublane-aligned tiles."""
    th_best = 1
    for th in range(1, H + 1):
        if H % th == 0 and th * W <= 128 and (th * W) % 8 == 0:
            th_best = th
    if (th_best * W) % 8 != 0:
        th_best = H   # full-image block (block == full dim, always legal)
    return th_best


def binary_hyper_conv3x3(x_nchw, weight, bias, *, activation_binarize=True,
                         weight_binarize=True):
    """x_nchw: [N, Cin, H, W] f32; weight: [Cout, Cin, 3, 3]; bias: [Cout]."""
    N, Cin, H, W = x_nchw.shape
    Cout = weight.shape[0]
    LANES = 128
    Cout_p = ((Cout + LANES - 1) // LANES) * LANES

    # bf16 is lossless for {-1, 0, +1}; keep f32 if either operand is not binarized.
    compute_dtype = (jnp.bfloat16 if (activation_binarize and weight_binarize)
                     else jnp.float32)

    # --- activation: binarize once, NCHW -> NHWC, zero-pad spatial (pad=1). ---
    x = x_nchw.astype(jnp.float32)
    if activation_binarize:
        x = jnp.sign(x)                       # torch.sign semantics: 0 -> 0
    x_nhwc = jnp.transpose(x, (0, 2, 3, 1))
    x_pad = jnp.pad(x_nhwc, ((0, 0), (1, 1), (1, 1), (0, 0))).astype(compute_dtype)

    # --- weight: binarize once, fuse 9 taps into [9*Cin, Cout_pad]. ---
    w = weight.astype(jnp.float32)
    if weight_binarize:
        w = jnp.sign(w)
    # [Cout, Cin, 3, 3] -> [3, 3, Cin, Cout] -> [9*Cin, Cout]; row = (dy*3+dx)*Cin+c
    w_taps = jnp.transpose(w, (2, 3, 1, 0)).reshape(9 * Cin, Cout)
    w_fused = (jnp.zeros((9 * Cin, Cout_p), jnp.float32)
               .at[:, :Cout].set(w_taps).astype(compute_dtype))

    b_pad = (jnp.zeros((1, Cout_p), jnp.float32)
             .at[0, :Cout].set(bias.astype(jnp.float32)))

    TH = _pick_row_tile(H, W)
    T = H // TH

    kernel = functools.partial(_binary_conv3x3_kernel, TH=TH, W=W, Cin=Cin)

    out_padded = pl.pallas_call(
        kernel,
        out_shape=jax.ShapeDtypeStruct((N, H * W, Cout_p), jnp.float32),
        grid_spec=pltpu.PrefetchScalarGridSpec(
            num_scalar_prefetch=0,
            grid=(N, T),
            in_specs=[
                # Full padded image per batch; index does not depend on t, so it
                # is DMA'd once per batch element, not once per row tile.
                pl.BlockSpec((1, H + 2, W + 2, Cin), lambda n, t: (n, 0, 0, 0)),
                # Weight / bias: constant blocks, fetched once.
                pl.BlockSpec((9 * Cin, Cout_p), lambda n, t: (0, 0)),
                pl.BlockSpec((1, Cout_p), lambda n, t: (0, 0)),
            ],
            out_specs=pl.BlockSpec((1, TH * W, Cout_p), lambda n, t: (n, t, 0)),
        ),
        compiler_params=pltpu.CompilerParams(
            dimension_semantics=("parallel", "parallel"),
            vmem_limit_bytes=32 * 1024 * 1024,
        ),
    )(x_pad, w_fused, b_pad)

    # Glue back to PyTorch NCHW convention; drop the Cout lane padding.
    out = out_padded[:, :, :Cout].reshape(N, H, W, Cout)
    return jnp.transpose(out, (0, 3, 1, 2))


def _reference(x_nchw, weight, bias, *, activation_binarize=True,
               weight_binarize=True):
    xb = jnp.sign(x_nchw) if activation_binarize else x_nchw
    wb = jnp.sign(weight) if weight_binarize else weight
    out = jax.lax.conv_general_dilated(
        xb, wb, window_strides=(1, 1), padding=((1, 1), (1, 1)),
        dimension_numbers=("NCHW", "OIHW", "NCHW"))
    return out + bias.reshape(1, -1, 1, 1)


if __name__ == "__main__":
    # Small shapes consistent with module defaults (in_chs=16, out_chs=16, 3x3, pad=1).
    N, Cin, Cout, H, W = 2, 16, 16, 16, 16

    key = jax.random.PRNGKey(0)
    kx, kw, kb = jax.random.split(key, 3)
    x = jax.random.normal(kx, (N, Cin, H, W), dtype=jnp.float32)
    fan_in = Cin * 3 * 3
    weight = jax.random.normal(kw, (Cout, Cin, 3, 3), dtype=jnp.float32) * (
        (2.0 / fan_in) ** 0.5)
    bound = 1.0 / (fan_in ** 0.5)
    bias = jax.random.uniform(kb, (Cout,), dtype=jnp.float32,
                              minval=-bound, maxval=bound)

    conv = jax.jit(lambda xx, ww, bb: binary_hyper_conv3x3(xx, ww, bb))
    out = jax.block_until_ready(conv(x, weight, bias))

    ref = jax.block_until_ready(_reference(x, weight, bias))
    np.testing.assert_allclose(np.asarray(out), np.asarray(ref),
                               rtol=1e-5, atol=1e-5)
    print("KERNEL_OK")
</pallas_src>

<mosaic_0001>
module attributes {stable_mosaic.version = 11 : i64} {
  func.func @_binary_conv3x3_kernel(%arg0: i32, %arg1: i32, %arg2: memref<1x18x18x16xbf16, #tpu.memory_space<vmem>>, %arg3: memref<144x128xbf16, #tpu.memory_space<vmem>>, %arg4: memref<1x128xf32, #tpu.memory_space<vmem>>, %arg5: memref<1x128x128xf32, #tpu.memory_space<vmem>>) attributes {dimension_semantics = [#tpu.dimension_semantics<parallel>, #tpu.dimension_semantics<parallel>], iteration_bounds = array<i64: 2, 2>, scalar_prefetch = 0 : i64, scratch_operands = 0 : i64, tpu.core_type = #tpu.core_type<tc>, window_params = [{transform_indices = @transform_0, window_bounds = array<i64: 1, 18, 18, 16>}, {pipeline_mode = #tpu.pipeline_mode<synchronous>, transform_indices = @transform_1, window_bounds = array<i64: 144, 128>}, {pipeline_mode = #tpu.pipeline_mode<synchronous>, transform_indices = @transform_2, window_bounds = array<i64: 1, 128>}, {transform_indices = @transform_3, window_bounds = array<i64: 1, 128, 128>}]} {
    %c8_i32 = arith.constant 8 : i32
    %0 = arith.muli %arg1, %c8_i32 : i32
    %1 = tpu.assume_multiple %0, 8 : i32
    %c0 = arith.constant 0 : index
    %2 = arith.index_cast %1 : i32 to index
    %c0_0 = arith.constant 0 : index
    %c0_1 = arith.constant 0 : index
    %3 = vector.load %arg2[%c0, %2, %c0_0, %c0_1] : memref<1x18x18x16xbf16, #tpu.memory_space<vmem>>, vector<1x10x18x16xbf16>
    %4 = vector.shape_cast %3 : vector<1x10x18x16xbf16> to vector<10x18x16xbf16>
    %5 = vector.extract_strided_slice %4 {offsets = [0, 0, 0], sizes = [8, 16, 16], strides = [1, 1, 1]} : vector<10x18x16xbf16> to vector<8x16x16xbf16>
    %6 = vector.shape_cast %5 : vector<8x16x16xbf16> to vector<128x16xbf16>
    %7 = vector.extract_strided_slice %4 {offsets = [0, 1, 0], sizes = [8, 16, 16], strides = [1, 1, 1]} : vector<10x18x16xbf16> to vector<8x16x16xbf16>
    %8 = vector.shape_cast %7 : vector<8x16x16xbf16> to vector<128x16xbf16>
    %9 = vector.extract_strided_slice %4 {offsets = [0, 2, 0], sizes = [8, 16, 16], strides = [1, 1, 1]} : vector<10x18x16xbf16> to vector<8x16x16xbf16>
    %10 = vector.shape_cast %9 : vector<8x16x16xbf16> to vector<128x16xbf16>
    %11 = vector.extract_strided_slice %4 {offsets = [1, 0, 0], sizes = [8, 16, 16], strides = [1, 1, 1]} : vector<10x18x16xbf16> to vector<8x16x16xbf16>
    %12 = vector.shape_cast %11 : vector<8x16x16xbf16> to vector<128x16xbf16>
    %13 = vector.extract_strided_slice %4 {offsets = [1, 1, 0], sizes = [8, 16, 16], strides = [1, 1, 1]} : vector<10x18x16xbf16> to vector<8x16x16xbf16>
    %14 = vector.shape_cast %13 : vector<8x16x16xbf16> to vector<128x16xbf16>
    %15 = vector.extract_strided_slice %4 {offsets = [1, 2, 0], sizes = [8, 16, 16], strides = [1, 1, 1]} : vector<10x18x16xbf16> to vector<8x16x16xbf16>
    %16 = vector.shape_cast %15 : vector<8x16x16xbf16> to vector<128x16xbf16>
    %17 = vector.extract_strided_slice %4 {offsets = [2, 0, 0], sizes = [8, 16, 16], strides = [1, 1, 1]} : vector<10x18x16xbf16> to vector<8x16x16xbf16>
    %18 = vector.shape_cast %17 : vector<8x16x16xbf16> to vector<128x16xbf16>
    %19 = vector.extract_strided_slice %4 {offsets = [2, 1, 0], sizes = [8, 16, 16], strides = [1, 1, 1]} : vector<10x18x16xbf16> to vector<8x16x16xbf16>
    %20 = vector.shape_cast %19 : vector<8x16x16xbf16> to vector<128x16xbf16>
    %21 = vector.extract_strided_slice %4 {offsets = [2, 2, 0], sizes = [8, 16, 16], strides = [1, 1, 1]} : vector<10x18x16xbf16> to vector<8x16x16xbf16>
    %22 = vector.shape_cast %21 : vector<8x16x16xbf16> to vector<128x16xbf16>
    %23 = tpu.concatenate %6, %8, %10, %12, %14, %16, %18, %20, %22 in 1 : vector<128x16xbf16>, vector<128x16xbf16>, vector<128x16xbf16>, vector<128x16xbf16>, vector<128x16xbf16>, vector<128x16xbf16>, vector<128x16xbf16>, vector<128x16xbf16>, vector<128x16xbf16> -> vector<128x144xbf16>
    %c0_2 = arith.constant 0 : index
    %c0_3 = arith.constant 0 : index
    %24 = vector.load %arg3[%c0_2, %c0_3] : memref<144x128xbf16, #tpu.memory_space<vmem>>, vector<144x128xbf16>
    %cst = arith.constant dense<0.000000e+00> : vector<128x128xf32>
    %25 = tpu.matmul %23, %24, %cst {dimension_numbers = #tpu.dot_dimension_numbers<[1], [0], [0], [1], [0, 0, 1, 1], [], []>} : vector<128x144xbf16>, vector<144x128xbf16>, vector<128x128xf32> -> vector<128x128xf32>
    %c0_4 = arith.constant 0 : index
    %c0_5 = arith.constant 0 : index
    %26 = vector.load %arg4[%c0_4, %c0_5] : memref<1x128xf32, #tpu.memory_space<vmem>>, vector<1x128xf32>
    %27 = vector.broadcast %26 : vector<1x128xf32> to vector<128x128xf32>
    %28 = arith.addf %25, %27 : vector<128x128xf32>
    %c0_6 = arith.constant 0 : index
    %c0_7 = arith.constant 0 : index
    %c0_8 = arith.constant 0 : index
    %29 = vector.load %arg5[%c0_6, %c0_7, %c0_8] : memref<1x128x128xf32, #tpu.memory_space<vmem>>, vector<1x128x128xf32>
    %30 = vector.shape_cast %29 : vector<1x128x128xf32> to vector<128x128xf32>
    %31 = vector.shape_cast %28 : vector<128x128xf32> to vector<1x128x128xf32>
    tpu.vector_store %arg5[%c0_6, %c0_7, %c0_8], %31 {strides = array<i32>} : memref<1x128x128xf32, #tpu.memory_space<vmem>>, vector<1x128x128xf32>,
    return
  }
  func.func @transform_0(%arg0: i32, %arg1: i32) -> (i32, i32, i32, i32) {
    %c0_i32 = arith.constant 0 : i32
    %c0_i32_0 = arith.constant 0 : i32
    %c0_i32_1 = arith.constant 0 : i32
    %c0_i32_2 = arith.constant 0 : i32
    return %arg0, %c0_i32, %c0_i32_0, %c0_i32_1 : i32, i32, i32, i32
  }
  func.func @transform_1(%arg0: i32, %arg1: i32) -> (i32, i32) {
    %c0_i32 = arith.constant 0 : i32
    %c0_i32_0 = arith.constant 0 : i32
    %c0_i32_1 = arith.constant 0 : i32
    return %c0_i32, %c0_i32_0 : i32, i32
  }
  func.func @transform_2(%arg0: i32, %arg1: i32) -> (i32, i32) {
    %c0_i32 = arith.constant 0 : i32
    %c0_i32_0 = arith.constant 0 : i32
    %c0_i32_1 = arith.constant 0 : i32
    return %c0_i32, %c0_i32_0 : i32, i32
  }
  func.func @transform_3(%arg0: i32, %arg1: i32) -> (i32, i32, i32) {
    %c0_i32 = arith.constant 0 : i32
    %c0_i32_0 = arith.constant 0 : i32
    return %arg0, %arg1, %c0_i32 : i32, i32, i32
  }
}

</mosaic_0001>

<bundles_post_ra>
// kernel: _lambda_.1
= control target key start
LH: loop header
LB: loop body
LE: loop exit
PB: predicated region body
PF: predicated region fallthrough
CT: control target
= control target key end

     0   :  { %s1441_s12 = smov 0   ;;  %s1443_s13 = smov 0   ;;  %s2105_s0 = inlined_call_operand.vmem [shape: bf16[2,18,18,16], index: 0, kind: input, shape index: {}]   ;;  %s2106_s1 = inlined_call_operand.vmem [shape: bf16[144,128], index: 1, kind: input, shape index: {}]   ;;  %s2107_s2 = inlined_call_operand.vmem [shape: f32[1,128], index: 2, kind: input, shape index: {}]   ;;  %s2108_s3 = inlined_call_operand.vmem [shape: f32[2,256,128], index: 3, kind: output, shape index: {}]  }
   0x1   :  { %s1445_s14 = smov 0   ;;  %s1447_s15 = smov 0  }
   0x2   :  { %s1449_s16 = smov 0  }
   0x3 LB: > { %s22_s17 = sadd.s32 1, %s1403_s14  ;;  %s25_s18 = sadd.s32 1, %s1407_s15  ;;  %s1411_s16 = sphi %s1449_s16, %s13_s16   ;;  %s1407_s15 = sphi %s1447_s15, %s2116_s15   ;;  %s1403_s14 = sphi %s1445_s14, %s2115_s14   ;;  %s1399_s13 = sphi %s1443_s13, %s2114_s13   ;;  %s1395_s12 = sphi %s1441_s12, %s2113_s12  }
   0x4   : > { %p23_p0 = scmp.ge.s32.totalorder %s22_s17, 2  ;;  %p1218_p1 = scmp.ge.s32.totalorder %s1411_s16, 1 }
   0x5   : > { %p151_p2 = scmp.lt.s32.totalorder %s1411_s16, 5 }
   0x6   : > { %s2118_s17 = smov (%p23_p0, %s22_s17), 0  ;;  %s2120_s18 = smov (!%p23_p0, %s25_s18), %s1407_s15 }
   0x7   : > { %p152_p3 = pnand %p1218_p1, %p151_p2  ;;  %p27_p4 = scmp.ge.s32.totalorder %s2120_s18, 2 }
   0x8   : > { %p179_p5 = scmp.lt.s32.totalorder (!%p152_p3), %s1399_s13, 1  ;;  %s1286_s21 = smul.u32 (!%p152_p3), 96, %s1395_s12 }
   0x9   : > { %s2122_s18 = smov (%p27_p4, %s2120_s18), 0  ;;  %155 = sbr.rel (%p152_p3) target bundleno = 459 (0x1cb), region = 32 }
   0xa   : > { %s1414_s6 = smov (!%p152_p3), 48   ;;  %s1415_s9 = smov (!%p152_p3), 96  }
   0xb   : > { %s1416_s19 = smov (!%p152_p3), 80   ;;  %s1417_s20 = smov (!%p152_p3), 32  }
   0xc   : > { %s1418_s25 = smov (!%p152_p3), 16   ;;  %s1419_s29 = smov (!%p152_p3), 64  }
   0xd   : > { %s1420_s30 = smov (!%p152_p3), 112  }
   0xe   : > { %v1363_v0 = vld [vmem:[%s2106_s1 + $0x38] sm:$0xff]   ;;  %s2124_s13 = smov (!%p179_p5, %s1399_s13), 1  ;;  %v1413_v1 = vmov 0   ;;  %v1364_v2 = vld [vmem:[%s2106_s1 + $0x30] sm:$0xff]   ;;  %vm448_vm0 = vcmask 1042432   ;;  %vm449_vm1 = vcmask 1046532  }
   0xf   : > { %1015 = vmatprep.subr.bf16.mxu0 %v1413_v1  ;;  %1287 = vmatprep.subr.bf16.mxu1 %v1413_v1  ;;  %s1305_s22 = smul.u32 216, %s2124_s13  ;;  %v1365_v3 = vld [vmem:[%s2106_s1 + $0x28] sm:$0xff]   ;;  %v1366_v17 = vld [vmem:[%s2106_s1 + $0x20] sm:$0xff]   ;;  %vm229_vm2 = vsmask.f32 3328  ;;  %vm1548_vm4 = vmor %vm448_vm0, %vm449_vm1  ;;  %vm777_vm6 = vcmask 130048  }
  0x10   : > { %1016 = vmatpush1.bf16.msra.mxu0 %v1363_v0  ;;  %1296 = vmatpush1.bf16.msra.mxu1 %v1363_v0  ;;  %vm230_vm3 = vsmask.f32 7440  ;;  %v1367_v34 = vld [vmem:[%s2106_s1 + $0x18] sm:$0xff]   ;;  %v1368_v61 = vld [vmem:[%s2106_s1 + $0x10] sm:$0xff]   ;;  %vm802_vm7 = vcmask 261120   ;;  %vm819_vm8 = vcmask 392192  }
  0x11   : > { %1017 = vmatprep.subr.bf16.mxu0 %v1413_v1  ;;  %1288 = vmatprep.subr.bf16.mxu1 %v1413_v1  ;;  %s183_s27 = scalar_lea.vmem %s2105_s0, %s1305_s22  ;;  %vm1636_vm5 = vmor %vm229_vm2, %vm230_vm3  ;;  %vm836_vm9 = vcmask 523264   ;;  %vm853_vm10 = vcmask 654336   ;;  %vm870_vm11 = vcmask 785408   ;;  %vm887_vm12 = vcmask 916480   ;;  %s1221_s4 = sshll.u32 %s2124_s13, 5 }
  0x12   : > { %s1490_s28 = scalar_lea.vmem %s183_s27, %s1286_s21 }
  0x13   : > { %v1496_v4 = vld [vmem:[%s1490_s28 + $0x3c] sm:$0xf]  ;;  %v1499_v5 = vld [vmem:[%s1490_s28 + $0x40] sm:$0xf]  ;;  %v202_v6 = vld [vmem:[%s1490_s28 + $0xc] sm:$0xf] }
  0x14   : > { %1018 = vmatpush1.bf16.msra.mxu0 %v1364_v2  ;;  %1297 = vmatpush1.bf16.msra.mxu1 %v1364_v2  ;;  %v366_v7 = vshrl.u32 %v1499_v5, 16  ;;  %v1507_v8 = vcombine.low %v1496_v4, %v1499_v5  ;;  %v353_v9 = vshrl.u32 %v1496_v4, 16  ;;  %v356_v10 = vshll.u32 %v1496_v4, 16  ;;  %v1512_v11 = vld [vmem:[%s1490_s28 + $0x10] sm:$0xf] }
  0x15   : > { %1019 = vmatprep.subr.bf16.mxu0 %v1413_v1  ;;  %1289 = vmatprep.subr.bf16.mxu1 %v1413_v1  ;;  %v266_v12 = vshll.u32 %v1512_v11, 16  ;;  %v270_v13 = vshrl.u32 %v1512_v11, 16  ;;  %v1517_v14 = vcombine.low %v202_v6, %v1512_v11  ;;  %v257_v15 = vshrl.u32 %v202_v6, 16  ;;  %v1520_v16 = vld [vmem:[%s1490_s28 + $0x48] sm:$0xf] }
  0x16   : > { %690 = vrot.lane.b32.xlu1 %v1507_v8, %s1414_s6  ;;  %v260_v18 = vshll.u32 %v202_v6, 16  ;;  %v1528_v19 = vld [vmem:[%s1490_s28 + $0x4c] sm:$0xf]  ;;  %v377_v20 = vshrl.u32 %v1520_v16, 16  ;;  %v380_v21 = vshll.u32 %v1520_v16, 16  ;;  %v1227_v22 = vrot.slane %v202_v6, 9 }
  0x17   : > { %v1532_v23 = vrot.slane %v270_v13, 4  ;;  %682 = vrot.lane.b32.xlu0 %v1517_v14, %s1414_s6  ;;  %v1536_v24 = vrot.slane %v257_v15, 4  ;;  %v390_v25 = vshrl.u32 %v1528_v19, 16  ;;  %v1541_v26 = vcombine.low %v1520_v16, %v1528_v19  ;;  %v1544_v27 = vld [vmem:[%s1490_s28 + $0x18] sm:$0xf] }
  0x18   : > { %1020 = vmatpush1.bf16.msra.mxu0 %v1365_v3  ;;  %1298 = vmatpush1.bf16.msra.mxu1 %v1365_v3  ;;  %v1552_v29 = vrot.slane %v260_v18, 5  ;;  %v1555_v30 = vld [vmem:[%s1490_s28 + $0x1c] sm:$0xf]  ;;  %v281_v31 = vshrl.u32 %v1544_v27, 16  ;;  %v284_v32 = vshll.u32 %v1544_v27, 16  ;;  %v460_v33 = vrot.slane %v1512_v11, 5 }
  0x19   : > { %1021 = vmatprep.subr.bf16.mxu0 %v1413_v1  ;;  %1290 = vmatprep.subr.bf16.mxu1 %v1413_v1  ;;  %v294_v35 = vshrl.u32 %v1555_v30, 16  ;;  %v1568_v36 = vcombine.low %v1544_v27, %v1555_v30  ;;  %v1571_v37 = vld [vmem:[%s1490_s28 + $0x14] sm:$0x1]  ;;  %v1574_v38 = vld [vmem:[%s1490_s28] sm:$0xf]  ;;  %v1231_v39 = vrot.slane %v1496_v4, 9 }
  0x1a   : > { %747 = vrot.lane.b32.xlu1 %v1541_v26, %s1415_s9  ;;  %v461_v40 = vsel %vm1548_vm4, %v1227_v22, %v460_v33  ;;  %v462_v41 = vrot.slane %v460_v33, 4  ;;  %v463_v42 = vrot.slane %v1571_v37, 5  ;;  %v1583_v43 = vld [vmem:[%s1490_s28 + $0x4] sm:$0xf]  ;;  %v201_v44 = vld [vmem:[%s1490_s28 + $0x8] sm:$0x1]  ;;  %v263_v45 = vor.u32 %v1552_v29, %v1536_v24 }
  0x1b   : > { %739 = vrot.lane.b32.xlu0 %v1568_v36, %s1415_s9  ;;  %v1226_v46 = vrot.slane %v1574_v38, 9  ;;  %v453_v47 = vrot.slane %v1583_v43, 5  ;;  %v456_v48 = vrot.slane %v201_v44, 5  ;;  %v1593_v49 = vld [vmem:[%s1490_s28 + $0x30] sm:$0xf]  ;;  %v233_v50 = vshrl.u32 %v1574_v38, 16 }
  0x1c   : > { %1022 = vmatpush1.bf16.msra.mxu0 %v1366_v17  ;;  %1299 = vmatpush1.bf16.msra.mxu1 %v1366_v17  ;;  %v464_v51 = vsel %vm1548_vm4, %v462_v41, %v463_v42  ;;  %v1599_v52 = vld [vmem:[%s1490_s28 + $0x34] sm:$0xf]  ;;  %v1602_v53 = vld [vmem:[%s1490_s28 + $0x38] sm:$0x1]  ;;  %v1230_v54 = vrot.slane %v1593_v49, 9  ;;  %v236_v55 = vshll.u32 %v1574_v38, 16  ;;  %v1236_v56 = vcombine.low %v1574_v38, %v1583_v43 }
  0x1d   : > { %1023 = vmatprep.subr.bf16.mxu0 %v1413_v1  ;;  %1291 = vmatprep.subr.bf16.mxu1 %v1413_v1  ;;  %v1610_v57 = vcombine.low %v461_v40, %v464_v51  ;;  %v454_v58 = vsel %vm1548_vm4, %v1226_v46, %v453_v47  ;;  %v455_v59 = vrot.slane %v453_v47, 4  ;;  %v481_v60 = vrot.slane %v1599_v52, 5  ;;  %v1621_v3 = vld [vmem:[%s1490_s28 + $0x44] sm:$0x1] }
  0x1e   : > { %v484_v62 = vrot.slane %v1602_v53, 5  ;;  %v235_v63 = vrot.slane %v233_v50, 4  ;;  %v238_v0 = vrot.slane %v236_v55, 5  ;;  %v242_v2 = vshll.u32 %v1583_v43, 16 }
  0x1f   : > { %720 = vrot.lane.b32.xlu0 %v1610_v57, %s1416_s19  ;;  %v457_v6 = vsel %vm1548_vm4, %v455_v59, %v456_v48  ;;  %v482_v13 = vsel %vm1548_vm4, %v1230_v54, %v481_v60  ;;  %v483_v15 = vrot.slane %v481_v60, 4  ;;  %v246_v17 = vshrl.u32 %v1583_v43, 16  ;;  %v1370_v54 = vld [vmem:[%s2106_s1 + $0x8] sm:$0xff]  }
  0x20   : > { %1024 = vmatpush1.bf16.msra.mxu0 %v1367_v34  ;;  %1300 = vmatpush1.bf16.msra.mxu1 %v1367_v34  ;;  %v1252_v18 = vcombine.low %v454_v58, %v457_v6  ;;  %v239_v22 = vor.u32 %v238_v0, %v235_v63  ;;  %v244_v33 = vrot.slane %v242_v2, 5  ;;  %v252_v40 = vshll.u32 %v201_v44, 16 }
  0x21   : > { %1025 = vmatprep.subr.bf16.mxu0 %v1413_v1  ;;  %1292 = vmatprep.subr.bf16.mxu1 %v1413_v1  ;;  %v485_v41 = vsel %vm1548_vm4, %v483_v15, %v484_v62  ;;  %v248_v46 = vrot.slane %v246_v17, 4  ;;  %v488_v34 = vrot.slane %v1499_v5, 5  ;;  %v491_v47 = vrot.slane %v1621_v3, 5 }
  0x22   : > { %663 = vrot.lane.b32.xlu1 %v1252_v18, %s1417_s20  ;;  %v1643_v44 = vcombine.low %v482_v13, %v485_v41  ;;  %v240_v48 = vrot.slane %v239_v22, 4  ;;  %v254_v50 = vrot.slane %v252_v40, 5  ;;  %v329_v51 = vshrl.u32 %v1593_v49, 16 }
  0x23   : > { %v249_v55 = vor.u32 %v248_v46, %v244_v33  ;;  %v489_v58 = vsel %vm1548_vm4, %v1231_v39, %v488_v34  ;;  %v490_v59 = vrot.slane %v488_v34, 4  ;;  %v332_v60 = vshll.u32 %v1593_v49, 16 }
  0x24   : > { %1026 = vmatpush1.bf16.msra.mxu0 %v1368_v61  ;;  %1301 = vmatpush1.bf16.msra.mxu1 %v1368_v61  ;;  %v245_v62 = vsel %vm1636_vm5, %v240_v48, %v244_v33  ;;  %v331_v63 = vrot.slane %v329_v51, 4  ;;  %v338_v0 = vshll.u32 %v1599_v52, 16  ;;  %v342_v2 = vshrl.u32 %v1599_v52, 16 }
  0x25   : > { %1027 = vmatprep.subr.bf16.mxu0 %v1413_v1  ;;  %1293 = vmatprep.subr.bf16.mxu1 %v1413_v1  ;;  %v250_v6 = vrot.slane %v249_v55, 4  ;;  %v492_v39 = vsel %vm1548_vm4, %v490_v59, %v491_v47  ;;  %v334_v13 = vrot.slane %v332_v60, 5  ;;  %v348_v15 = vshll.u32 %v1602_v53, 16  ;;  %v1371_v53 = vld [vmem:[%s2106_s1] sm:$0xff]   ;;  %v1704_v60 = vld [vmem:[%s1490_s28 + $0x50] sm:$0x1] }
  0x26   : > { %671 = vrot.lane.b32.xlu1 %v1643_v44, %s1417_s20  ;;  %v1665_v61 = vcombine.low %v489_v58, %v492_v39  ;;  %v340_v17 = vrot.slane %v338_v0, 5  ;;  %v344_v18 = vrot.slane %v342_v2, 4  ;;  %v355_v22 = vrot.slane %v353_v9, 4 }
  0x27   : > { %v255_v33 = vsel %vm1636_vm5, %v250_v6, %v254_v50  ;;  %v335_v40 = vor.u32 %v334_v13, %v331_v63  ;;  %v350_v41 = vrot.slane %v348_v15, 5  ;;  %v358_v46 = vrot.slane %v356_v10, 5 }
  0x28   : > { %1028 = vmatpush1.bf16.msra.mxu0 %v1370_v54  ;;  %1302 = vmatpush1.bf16.msra.mxu1 %v1370_v54  ;;  %v1244_v34 = vcombine.low %v245_v62, %v255_v33  ;;  %v345_v47 = vor.u32 %v344_v18, %v340_v17  ;;  %v362_v9 = vshll.u32 %v1499_v5, 16  ;;  %v368_v48 = vrot.slane %v366_v7, 4 }
  0x29   : > { %1029 = vmatprep.subr.bf16.mxu0 %v1413_v1  ;;  %1294 = vmatprep.subr.bf16.mxu1 %v1413_v1  ;;  %v336_v50 = vrot.slane %v335_v40, 4  ;;  %v359_v51 = vor.u32 %v358_v46, %v355_v22  ;;  %v372_v4 = vshll.u32 %v1621_v3, 16  ;;  %v264_v10 = vrot.slane %v263_v45, 4  ;;  %v1372_v45 = vld [vmem:[%s2106_s1 + $0x40] sm:$0xff]  }
  0x2a   : > { %623 = vrot.lane.b32.xlu0 %v1244_v34, %s1418_s25  ;;  %728 = vrot.lane.b32.xlu1 %v1665_v61, %s1416_s19  ;;  %v346_v54 = vrot.slane %v345_v47, 4  ;;  %v364_v5 = vrot.slane %v362_v9, 5  ;;  %v268_v7 = vrot.slane %v266_v12, 5  ;;  %v276_v55 = vshll.u32 %v1571_v37, 16  ;;  %v1729_v22 = vld [vmem:[%s1490_s28 + $0x20] sm:$0x1] }
  0x2b   : > { %v341_v3 = vsel %vm1636_vm5, %v336_v50, %v340_v17  ;;  %v360_v58 = vrot.slane %v359_v51, 4  ;;  %v374_v24 = vrot.slane %v372_v4, 5  ;;  %v379_v29 = vrot.slane %v377_v20, 4 }
  0x2c   : > { %1030 = vmatpush1.bf16.msra.mxu0 %v1371_v53  ;;  %1303 = vmatpush1.bf16.msra.mxu1 %v1371_v53  ;;  %v351_v11 = vsel %vm1636_vm5, %v346_v54, %v350_v41  ;;  %v369_v12 = vor.u32 %v368_v48, %v364_v5  ;;  %v269_v37 = vsel %vm1636_vm5, %v264_v10, %v268_v7  ;;  %v278_v63 = vrot.slane %v276_v55, 5 }
  0x2d   : > { %v273_v59 = vor.u32 %v1532_v23, %v268_v7  ;;  %1045 = vmatprep.subr.bf16.mxu0 %v1413_v1  ;;  %v1707_v20 = vcombine.low %v341_v3, %v351_v11  ;;  %v365_v62 = vsel %vm1636_vm5, %v360_v58, %v364_v5  ;;  %v382_v0 = vrot.slane %v380_v21, 5  ;;  %1295 = vmatprep.subr.bf16.mxu1 %v1413_v1 }
  0x2e   : > { %v370_v2 = vrot.slane %v369_v12, 4  ;;  %v386_v23 = vshll.u32 %v1528_v19, 16  ;;  %v392_v39 = vrot.slane %v390_v25, 4  ;;  %v396_v15 = vshll.u32 %v1704_v60, 16 }
  0x2f   : > { %v274_v6 = vrot.slane %v273_v59, 4  ;;  %631 = vrot.lane.b32.xlu0 %v1707_v20, %s1418_s25  ;;  %v383_v13 = vor.u32 %v382_v0, %v379_v29  ;;  %v283_v17 = vrot.slane %v281_v31, 4  ;;  %v286_v21 = vrot.slane %v284_v32, 5  ;;  %v1770_v59 = vld [vmem:[%s1490_s28 + $0x24] sm:$0xf] }
  0x30   : > { %1046 = vmatpush2.bf16.msra.mxu0 %v1372_v45  ;;  %v375_v1 = vsel %vm1636_vm5, %v370_v2, %v374_v24  ;;  %v388_v25 = vrot.slane %v386_v23, 5  ;;  %v290_v33 = vshll.u32 %v1555_v30, 16  ;;  %1304 = vmatpush2.bf16.msra.mxu1 %v1372_v45  ;;  %v398_v46 = vrot.slane %v396_v15, 5  ;;  %v1756_v24 = vld [vmem:[%s1490_s28 + $0x54] sm:$0xf] }
  0x31   : > { %v279_v18 = vsel %vm1636_vm5, %v274_v6, %v278_v63  ;;  %v1732_v40 = vcombine.low %v365_v62, %v375_v1  ;;  %v384_v31 = vrot.slane %v383_v13, 4  ;;  %v287_v32 = vor.u32 %v286_v21, %v283_v17  ;;  %v1773_v62 = vld [vmem:[%s1490_s28 + $0x28] sm:$0xf]  ;;  %v1788_v13 = vld [vmem:[%s1490_s28 + $0x60] sm:$0xf] }
  0x32   : > { %v1245_v41 = vcombine.low %v269_v37, %v279_v18  ;;  %v393_v53 = vor.u32 %v392_v39, %v388_v25  ;;  %v292_v34 = vrot.slane %v290_v33, 5  ;;  %v296_v47 = vrot.slane %v294_v35, 4 }
  0x33   : > { %709 = vrot.lane.b32.xlu1 %v1732_v40, %s1419_s29  ;;  %v300_v9 = vshll.u32 %v1729_v22, 16  ;;  %v389_v48 = vsel %vm1636_vm5, %v384_v31, %v388_v25  ;;  %v288_v51 = vrot.slane %v287_v32, 4  ;;  %v495_v55 = vrot.slane %v1528_v19, 5  ;;  %v1763_v19 = vld [vmem:[%s1490_s28 + $0x58] sm:$0xf] }
  0x34   : > { %701 = vrot.lane.b32.xlu0 %v1245_v41, %s1419_s29  ;;  %v394_v50 = vrot.slane %v393_v53, 4  ;;  %v297_v4 = vor.u32 %v296_v47, %v292_v34  ;;  %v1232_v29 = vrot.slane %v1520_v16, 9  ;;  %v498_v11 = vrot.slane %v1704_v60, 5  ;;  %v1809_v32 = vld [vmem:[%s1490_s28 + $0x2c] sm:$0x1] }
  0x35   : > { %v302_v10 = vrot.slane %v300_v9, 5  ;;  %v293_v54 = vsel %vm1636_vm5, %v288_v51, %v292_v34  ;;  %v497_v45 = vrot.slane %v495_v55, 4  ;;  %v401_v12 = vshrl.u32 %v1756_v24, 16 }
  0x36   : > { %v399_v35 = vsel %vm1636_vm5, %v394_v50, %v398_v46  ;;  %v298_v5 = vrot.slane %v297_v4, 4  ;;  %v404_v37 = vshll.u32 %v1756_v24, 16  ;;  %v467_v63 = vrot.slane %v1555_v30, 5  ;;  %v1804_v46 = vld [vmem:[%s1490_s28 + $0x5c] sm:$0x1] }
  0x37   : > { %v1746_v7 = vcombine.low %v389_v48, %v399_v35  ;;  %v414_v16 = vshrl.u32 %v1763_v19, 16  ;;  %v410_v60 = vshll.u32 %v1763_v19, 16  ;;  %v496_v0 = vsel %vm1548_vm4, %v1232_v29, %v495_v55  ;;  %v1823_v4 = vld [vmem:[%s1490_s28 + $0x68] sm:$0x1]  ;;  %v1834_v55 = vld [vmem:[%s1490_s28 + $0x6c] sm:$0xf] }
  0x38   : > { %v303_v3 = vsel %vm1636_vm5, %v298_v5, %v302_v10  ;;  %v499_v2 = vsel %vm1548_vm4, %v497_v45, %v498_v11  ;;  %v305_v6 = vshrl.u32 %v1770_v59, 16  ;;  %v308_v23 = vshll.u32 %v1770_v59, 16 }
  0x39   : > { %766 = vrot.lane.b32.xlu1 %v1746_v7, %s1420_s30  ;;  %v1753_v58 = vcombine.low %v293_v54, %v303_v3  ;;  %v318_v30 = vshrl.u32 %v1773_v62, 16  ;;  %v314_v39 = vshll.u32 %v1773_v62, 16  ;;  %v1228_v15 = vrot.slane %v1544_v27, 9 }
  0x3a   : > { %v403_v17 = vrot.slane %v401_v12, 4  ;;  %v406_v21 = vrot.slane %v404_v37, 5  ;;  %v469_v1 = vrot.slane %v467_v63, 4  ;;  %v470_v18 = vrot.slane %v1729_v22, 5 }
  0x3b   : > { %758 = vrot.lane.b32.xlu0 %v1753_v58, %s1420_s30  ;;  %v1794_v25 = vrot.slane %v410_v60, 5  ;;  %v416_v33 = vrot.slane %v414_v16, 4  ;;  %v1801_v31 = vcombine.low %v496_v0, %v499_v2  ;;  %v508_v27 = vshrl.u32 %v1788_v13, 16 }
  0x3c   : > { %v511_v53 = vshll.u32 %v1788_v13, 16  ;;  %v307_v22 = vrot.slane %v305_v6, 4  ;;  %v310_v34 = vrot.slane %v308_v23, 5  ;;  %v1811_v47 = vrot.slane %v314_v39, 5 }
  0x3d   : > { %633 = vrot.lane.b32.xlu1 %v1732_v40, %s1418_s25  ;;  %v320_v9 = vrot.slane %v318_v30, 4  ;;  %v1819_v48 = vcombine.low %v1756_v24, %v1763_v19  ;;  %v407_v50 = vor.u32 %v406_v21, %v403_v17  ;;  %v471_v10 = vsel %vm1548_vm4, %v469_v1, %v470_v18  ;;  %v1853_v18 = vld [vmem:[%s1490_s28 + $0x74] sm:$0x1]  ;;  %1280 = vmatprep.mubr.msk.bf16.mxu1 %vm777_vm6, %v1801_v31 }
  0x3e   : > { %v417_v35 = vor.u32 %v416_v33, %v1794_v25  ;;  %v420_v54 = vshll.u32 %v1804_v46, 16  ;;  %v1831_v5 = vcombine.low %v1593_v49, %v1599_v52  ;;  %v324_v3 = vshll.u32 %v1809_v32, 16  ;;  %v1843_v49 = vld [vmem:[%s1490_s28 + $0x70] sm:$0xf] }
  0x3f   : > { %625 = vrot.lane.b32.xlu0 %v1245_v41, %s1418_s25  ;;  %v1797_v41 = vld [vmem:[%s1490_s28 + $0x64] sm:$0xf]  ;;  %v510_v29 = vrot.slane %v508_v27, 4  ;;  %v513_v45 = vrot.slane %v511_v53, 5  ;;  %v311_v12 = vor.u32 %v310_v34, %v307_v22  ;;  %v321_v37 = vor.u32 %v320_v9, %v1811_v47  ;;  %s1220_s28 = sshll.u32 %s1395_s12, 4 }
  0x40   : > { %v521_v51 = vshrl.u32 %v1797_v41, 16  ;;  %v517_v11 = vshll.u32 %v1797_v41, 16  ;;  %v527_v16 = vshll.u32 %v1823_v4, 16  ;;  %v408_v52 = vrot.slane %v407_v50, 4  ;;  %p187_p6 = scmp.lt.s32.totalorder %s1220_s28, 31 }
  0x41   : > { %673 = vrot.lane.b32.xlu1 %v1665_v61, %s1417_s20  ;;  %v514_v60 = vor.u32 %v513_v45, %v510_v29  ;;  %v542_v2 = vshrl.u32 %v1834_v55, 16  ;;  %v418_v23 = vrot.slane %v417_v35, 4  ;;  %v422_v30 = vrot.slane %v420_v54, 5 }
  0x42   : > { %v519_v0 = vrot.slane %v517_v11, 5  ;;  %v545_v39 = vshll.u32 %v1834_v55, 16  ;;  %v529_v21 = vrot.slane %v527_v16, 5  ;;  %v555_v1 = vshrl.u32 %v1843_v49, 16  ;;  %s2126_s28 = smov (!%p187_p6, %s1220_s28), 31 }
  0x43   : > { %665 = vrot.lane.b32.xlu0 %v1610_v57, %s1417_s20  ;;  %v468_v57 = vsel %vm1548_vm4, %v1228_v15, %v467_v63  ;;  %v523_v63 = vrot.slane %v521_v51, 4  ;;  %v515_v15 = vrot.slane %v514_v60, 4  ;;  %v312_v33 = vrot.slane %v311_v12, 4  ;;  %s190_s5 = sadd.s32 %s1221_s4, %s2126_s28 }
  0x44   : > { %v1254_v6 = vcombine.low %v468_v57, %v471_v10  ;;  %v322_v27 = vrot.slane %v321_v37, 4  ;;  %v326_v53 = vrot.slane %v324_v3, 5  ;;  %v544_v22 = vrot.slane %v542_v2, 4 }
  0x45   : > { %692 = vrot.lane.b32.xlu1 %v1541_v26, %s1414_s6  ;;  %v524_v17 = vor.u32 %v523_v63, %v519_v0  ;;  %v413_v34 = vsel %vm1636_vm5, %v408_v52, %v1794_v25  ;;  %v520_v9 = vsel %vm1636_vm5, %v515_v15, %v519_v0  ;;  %v547_v50 = vrot.slane %v545_v39, 5 }
  0x46   : > { %v423_v51 = vsel %vm1636_vm5, %v418_v23, %v422_v30  ;;  %v551_v10 = vshll.u32 %v1843_v49, 16  ;;  %v557_v35 = vrot.slane %v555_v1, 4  ;;  %v561_v54 = vshll.u32 %v1853_v18, 16  ;;  %1276 = vmatprep.mubr.msk.bf16.mxu0 %vm777_vm6, %v1254_v6 }
  0x47   : > { %684 = vrot.lane.b32.xlu0 %v1568_v36, %s1414_s6  ;;  %v525_v57 = vrot.slane %v524_v17, 4  ;;  %v1869_v3 = vcombine.low %v1770_v59, %v1773_v62  ;;  %v548_v29 = vor.u32 %v547_v50, %v544_v22  ;;  %v317_v45 = vsel %vm1636_vm5, %v312_v33, %v1811_v47 }
  0x48   : > { %v327_v11 = vsel %vm1636_vm5, %v322_v27, %v326_v53  ;;  %v553_v37 = vrot.slane %v551_v10, 5  ;;  %v1251_v63 = vcombine.low %v413_v34, %v423_v51  ;;  %v563_v60 = vrot.slane %v561_v54, 5 }
  0x49   : > { %711 = vrot.lane.b32.xlu1 %v1746_v7, %s1419_s29  ;;  %v530_v25 = vsel %vm1636_vm5, %v525_v57, %v529_v21  ;;  %v549_v16 = vrot.slane %v548_v29, 4  ;;  %v1247_v47 = vcombine.low %v317_v45, %v327_v11  ;;  %v502_v39 = vrot.slane %v1763_v19, 5 }
  0x4a   : > { %v1878_v12 = vcombine.low %v520_v9, %v530_v25  ;;  %v558_v52 = vor.u32 %v557_v35, %v553_v37  ;;  %v474_v15 = vrot.slane %v1773_v62, 5  ;;  %v1233_v17 = vrot.slane %v1756_v24, 9 }
  0x4b   : > { %703 = vrot.lane.b32.xlu0 %v1753_v58, %s1419_s29  ;;  %v554_v0 = vsel %vm1636_vm5, %v549_v16, %v553_v37  ;;  %v504_v42 = vrot.slane %v502_v39, 4  ;;  %v505_v21 = vrot.slane %v1804_v46, 5  ;;  %v1229_v1 = vrot.slane %v1770_v59, 9 }
  0x4c   : > { %v559_v2 = vrot.slane %v558_v52, 4  ;;  %v477_v19 = vrot.slane %v1809_v32, 5  ;;  %v1260_v32 = vcombine.low %v1788_v13, %v1797_v41  ;;  %v570_v33 = vrot.slane %v1843_v49, 5 }
  0x4d   : > { %730 = vrot.lane.b32.xlu1 %v1801_v31, %s1416_s19  ;;  %v506_v62 = vsel %vm1548_vm4, %v504_v42, %v505_v21  ;;  %v475_v24 = vsel %vm1548_vm4, %v1229_v1, %v474_v15  ;;  %v1234_v27 = vrot.slane %v1788_v13, 9  ;;  %v539_v22 = vrot.slane %v1823_v4, 5 }
  0x4e   : > { %v564_v23 = vsel %vm1636_vm5, %v559_v2, %v563_v60  ;;  %v1235_v34 = vrot.slane %v1834_v55, 9  ;;  %v573_v9 = vrot.slane %v1853_v18, 5  ;;  %v1263_v10 = vcombine.low %v1834_v55, %v1843_v49 }
  0x4f   : > { %722 = vrot.lane.b32.xlu0 %v1254_v6, %s1416_s19  ;;  %v1264_v30 = vcombine.low %v554_v0, %v564_v23 }
  0x50   : > { %v1958_v13 = vsel %vm1548_vm4, %v1235_v34, %v570_v33 }
  0x51   : > { %749 = vrot.lane.b32.xlu1 %v1819_v48, %s1415_s9 }
  0x53   : > { %741 = vrot.lane.b32.xlu0 %v1869_v3, %s1415_s9 }
  0x55   : > { %768 = vrot.lane.b32.xlu1 %v1251_v63, %s1420_s30 }
  0x57   : > { %760 = vrot.lane.b32.xlu0 %v1247_v47, %s1420_s30 }
  0x59   : > { %635 = vrot.lane.b32.xlu1 %v1746_v7, %s1418_s25  ;;  %v476_v7 = vrot.slane %v474_v15, 4 }
  0x5b   : > { %627 = vrot.lane.b32.xlu0 %v1753_v58, %s1418_s25  ;;  %v503_v58 = vsel %vm1548_vm4, %v1233_v17, %v502_v39  ;;  %v478_v59 = vsel %vm1548_vm4, %v476_v7, %v477_v19 }
  0x5c   : > { %v1922_v46 = vcombine.low %v475_v24, %v478_v59 }
  0x5d   : > { %675 = vrot.lane.b32.xlu1 %v1801_v31, %s1417_s20  ;;  %v1919_v31 = vcombine.low %v503_v58, %v506_v62 }
  0x5f   : > { %667 = vrot.lane.b32.xlu0 %v1254_v6, %s1417_s20  ;;  %v536_v6 = vrot.slane %v1797_v41, 5  ;;  %v572_v41 = vrot.slane %v570_v33, 4 }
  0x61   : > { %694 = vrot.lane.b32.xlu1 %v1819_v48, %s1414_s6  ;;  %v538_v53 = vrot.slane %v536_v6, 4  ;;  %v537_v57 = vsel %vm1548_vm4, %v1234_v27, %v536_v6  ;;  %v1962_v4 = vsel %vm1548_vm4, %v572_v41, %v573_v9 }
  0x62   : > { %v1265_v18 = vcombine.low %v1958_v13, %v1962_v4 }
  0x63   : > { %686 = vrot.lane.b32.xlu0 %v1869_v3, %s1414_s6  ;;  %v540_v50 = vsel %vm1548_vm4, %v538_v53, %v539_v22 }
  0x64   : > { %v1968_v51 = vcombine.low %v537_v57, %v540_v50 }
  0x65   : > { %713 = vrot.lane.b32.xlu1 %v1251_v63, %s1419_s29 }
  0x67   : > { %705 = vrot.lane.b32.xlu0 %v1247_v47, %s1419_s29 }
  0x69   : > { %732 = vrot.lane.b32.xlu1 %v1919_v31, %s1416_s19 }
  0x6b   : > { %724 = vrot.lane.b32.xlu0 %v1922_v46, %s1416_s19 }
  0x6d   : > { %751 = vrot.lane.b32.xlu1 %v1260_v32, %s1415_s9 }
  0x6f   : > { %743 = vrot.lane.b32.xlu0 %v1831_v5, %s1415_s9 }
  0x71   : > { %770 = vrot.lane.b32.xlu1 %v1878_v12, %s1420_s30 }
  0x73   : > { %762 = vrot.lane.b32.xlu0 %v1707_v20, %s1420_s30 }
  0x75   : > { %637 = vrot.lane.b32.xlu1 %v1251_v63, %s1418_s25 }
  0x77   : > { %629 = vrot.lane.b32.xlu0 %v1247_v47, %s1418_s25 }
  0x79   : > { %677 = vrot.lane.b32.xlu1 %v1919_v31, %s1417_s20 }
  0x7b   : > { %669 = vrot.lane.b32.xlu0 %v1922_v46, %s1417_s20 }
  0x7d   : > { %696 = vrot.lane.b32.xlu1 %v1260_v32, %s1414_s6 }
  0x7f   : > { %688 = vrot.lane.b32.xlu0 %v1831_v5, %s1414_s6  ;;  %s1222_s6 = sshll.u32 %s190_s5, 3 }
  0x80   : > { %s2072_s11 = scalar_lea.vmem %s2108_s3, %s1222_s6 }
  0x81   : > { %715 = vrot.lane.b32.xlu1 %v1878_v12, %s1419_s29 }
  0x83   : > { %707 = vrot.lane.b32.xlu0 %v1707_v20, %s1419_s29 }
  0x85   : > { %734 = vrot.lane.b32.xlu1 %v1968_v51, %s1416_s19 }
  0x87   : > { %726 = vrot.lane.b32.xlu0 %v1643_v44, %s1416_s19 }
  0x88   : > { %v691_v28 = vpop.permute.xlu1 %690 }
  0x89   : > { %753 = vrot.lane.b32.xlu1 %v1263_v10, %s1415_s9  ;;  %v683_v35 = vpop.permute.xlu0 %682 }
  0x8b   : > { %745 = vrot.lane.b32.xlu0 %v1507_v8, %s1415_s9 }
  0x8c   : > { %v748_v54 = vpop.permute.xlu1 %747 }
  0x8d   : > { %772 = vrot.lane.b32.xlu1 %v1264_v30, %s1420_s30  ;;  %v740_v20 = vpop.permute.xlu0 %739 }
  0x8f   : > { %764 = vrot.lane.b32.xlu0 %v1732_v40, %s1420_s30 }
  0x91   : > { %v721_v29 = vpop.permute.xlu0 %720 }
  0x94   : > { %v664_v25 = vpop.permute.xlu1 %663 }
  0x98   : > { %v672_v55 = vpop.permute.xlu1 %671 }
  0x9c   : > { %v624_v49 = vpop.permute.xlu0 %623  ;;  %v729_v11 = vpop.permute.xlu1 %728 }
  0x9d   : > { %v780_v45 = vsel %vm777_vm6, %v1236_v56, %v624_v49 }
  0x9e   : > { %v804_v37 = vsel %vm802_vm7, %v780_v45, %v664_v25 }
  0x9f   : > { %v821_v60 = vsel %vm819_vm8, %v804_v37, %v683_v35 }
  0xa1   : > { %v632_v12 = vpop.permute.xlu0 %631 }
  0xa2   : > { %v792_v63 = vsel %vm777_vm6, %v1831_v5, %v632_v12 }
  0xa3   : > { %v812_v40 = vsel %vm802_vm7, %v792_v63, %v672_v55 }
  0xa4   : > { %v829_v16 = vsel %vm819_vm8, %v812_v40, %v691_v28 }
  0xa5   : > { %v710_v52 = vpop.permute.xlu1 %709 }
  0xa6   : > { %v702_v38 = vpop.permute.xlu0 %701  ;;  %v846_v43 = vsel %vm836_vm9, %v829_v16, %v710_v52 }
  0xa7   : > { %v838_v56 = vsel %vm836_vm9, %v821_v60, %v702_v38  ;;  %v863_v47 = vsel %vm853_vm10, %v846_v43, %v729_v11 }
  0xa8   : > { %v855_v5 = vsel %vm853_vm10, %v838_v56, %v721_v29  ;;  %v880_v0 = vsel %vm870_vm11, %v863_v47, %v748_v54 }
  0xa9   : > { %v872_v23 = vsel %vm870_vm11, %v855_v5, %v740_v20 }
  0xab   : > { %v767_v2 = vpop.permute.xlu1 %766 }
  0xac   : > { %v901_v30 = vsel %vm887_vm12, %v880_v0, %v767_v2 }
  0xad   : > { %v759_v39 = vpop.permute.xlu0 %758  ;;  %1080 = vmatmul.mubr.bf16.vlgmr.msra.gmra.mxu1 %v901_v30 }
  0xae   : > { %v889_v15 = vsel %vm887_vm12, %v872_v23, %v759_v39  ;;  %1281 = vmatprep.mubr.msk.bf16.mxu1 %vm777_vm6, %v1919_v31 }
  0xaf   : > { %1048 = vmatmul.mubr.bf16.vlgmr.msra.gmra.mxu0 %v889_v15  ;;  %v634_v17 = vpop.permute.xlu1 %633 }
  0xb0   : > { %1277 = vmatprep.mubr.msk.bf16.mxu0 %vm777_vm6, %v1922_v46  ;;  %v795_v32 = vsel %vm777_vm6, %v1507_v8, %v634_v17 }
  0xb1   : > { %v626_v42 = vpop.permute.xlu0 %625 }
  0xb2   : > { %v783_v33 = vsel %vm777_vm6, %v1517_v14, %v626_v42 }
  0xb3   : > { %v674_v21 = vpop.permute.xlu1 %673 }
  0xb4   : > { %v814_v6 = vsel %vm802_vm7, %v795_v32, %v674_v21 }
  0xb5   : > { %v666_v1 = vpop.permute.xlu0 %665 }
  0xb6   : > { %v806_v27 = vsel %vm802_vm7, %v783_v33, %v666_v1 }
  0xb7   : > { %v693_v7 = vpop.permute.xlu1 %692 }
  0xb8   : > { %v831_v46 = vsel %vm819_vm8, %v814_v6, %v693_v7 }
  0xb9   : > { %v685_v19 = vpop.permute.xlu0 %684 }
  0xba   : > { %v823_v34 = vsel %vm819_vm8, %v806_v27, %v685_v19 }
  0xbb   : > { %v712_v58 = vpop.permute.xlu1 %711 }
  0xbc   : > { %v848_v53 = vsel %vm836_vm9, %v831_v46, %v712_v58 }
  0xbd   : > { %v704_v62 = vpop.permute.xlu0 %703 }
  0xbe   : > { %v840_v41 = vsel %vm836_vm9, %v823_v34, %v704_v62 }
  0xbf   : > { %v731_v24 = vpop.permute.xlu1 %730 }
  0xc0   : > { %v865_v9 = vsel %vm853_vm10, %v848_v53, %v731_v24 }
  0xc1   : > { %v723_v59 = vpop.permute.xlu0 %722 }
  0xc2   : > { %v857_v50 = vsel %vm853_vm10, %v840_v41, %v723_v59  ;;  %v1266_v41 = vld [vmem:[%s2107_s2] ss:$0 sm:$0xff] }
  0xc3   : > { %v750_v31 = vpop.permute.xlu1 %749 }
  0xc4   : > { %v882_v8 = vsel %vm870_vm11, %v865_v9, %v750_v31 }
  0xc5   : > { %v742_v22 = vpop.permute.xlu0 %741 }
  0xc6   : > { %v874_v10 = vsel %vm870_vm11, %v857_v50, %v742_v22 }
  0xc7   : > { %v769_v57 = vpop.permute.xlu1 %768 }
  0xc8   : > { %v904_v14 = vsel %vm887_vm12, %v882_v8, %v769_v57 }
  0xc9   : > { %v761_v28 = vpop.permute.xlu0 %760  ;;  %1088 = vmatmul.mubr.bf16.gmra.mxu1 %v904_v14 }
  0xca   : > { %v892_v35 = vsel %vm887_vm12, %v874_v10, %v761_v28  ;;  %1282 = vmatprep.mubr.msk.bf16.mxu1 %vm777_vm6, %v1968_v51 }
  0xcb   : > { %1056 = vmatmul.mubr.bf16.gmra.mxu0 %v892_v35  ;;  %v636_v54 = vpop.permute.xlu1 %635 }
  0xcc   : > { %1278 = vmatprep.mubr.msk.bf16.mxu0 %vm777_vm6, %v1643_v44  ;;  %v798_v63 = vsel %vm777_vm6, %v1541_v26, %v636_v54 }
  0xcd   : > { %v628_v20 = vpop.permute.xlu0 %627 }
  0xce   : > { %v786_v16 = vsel %vm777_vm6, %v1568_v36, %v628_v20 }
  0xcf   : > { %v676_v25 = vpop.permute.xlu1 %675 }
  0xd0   : > { %v816_v40 = vsel %vm802_vm7, %v798_v63, %v676_v25 }
  0xd1   : > { %v668_v29 = vpop.permute.xlu0 %667 }
  0xd2   : > { %v808_v52 = vsel %vm802_vm7, %v786_v16, %v668_v29 }
  0xd3   : > { %v695_v55 = vpop.permute.xlu1 %694 }
  0xd4   : > { %v833_v44 = vsel %vm819_vm8, %v816_v40, %v695_v55 }
  0xd5   : > { %v687_v49 = vpop.permute.xlu0 %686 }
  0xd6   : > { %v825_v43 = vsel %vm819_vm8, %v808_v52, %v687_v49 }
  0xd7   : > { %v714_v45 = vpop.permute.xlu1 %713 }
  0xd8   : > { %v850_v60 = vsel %vm836_vm9, %v833_v44, %v714_v45 }
  0xd9   : > { %v706_v11 = vpop.permute.xlu0 %705 }
  0xda   : > { %v842_v47 = vsel %vm836_vm9, %v825_v43, %v706_v11 }
  0xdb   : > { %v733_v12 = vpop.permute.xlu1 %732 }
  0xdc   : > { %v867_v56 = vsel %vm853_vm10, %v850_v60, %v733_v12 }
  0xdd   : > { %v725_v37 = vpop.permute.xlu0 %724 }
  0xde   : > { %v859_v0 = vsel %vm853_vm10, %v842_v47, %v725_v37 }
  0xdf   : > { %v752_v51 = vpop.permute.xlu1 %751 }
  0xe0   : > { %v884_v26 = vsel %vm870_vm11, %v867_v56, %v752_v51 }
  0xe1   : > { %v744_v38 = vpop.permute.xlu0 %743 }
  0xe2   : > { %v876_v2 = vsel %vm870_vm11, %v859_v0, %v744_v38 }
  0xe3   : > { %v771_v5 = vpop.permute.xlu1 %770 }
  0xe4   : > { %v907_v36 = vsel %vm887_vm12, %v884_v26, %v771_v5 }
  0xe5   : > { %v763_v23 = vpop.permute.xlu0 %762  ;;  %1096 = vmatmul.mubr.bf16.gmra.mxu1 %v907_v36 }
  0xe6   : > { %v895_v30 = vsel %vm887_vm12, %v876_v2, %v763_v23  ;;  %1283 = vmatprep.mubr.msk.bf16.mxu1 %vm777_vm6, %v1265_v18 }
  0xe7   : > { %1064 = vmatmul.mubr.bf16.gmra.mxu0 %v895_v30  ;;  %v638_v39 = vpop.permute.xlu1 %637 }
  0xe8   : > { %1279 = vmatprep.mubr.msk.bf16.mxu0 %vm777_vm6, %v1665_v61  ;;  %v801_v24 = vsel %vm777_vm6, %v1819_v48, %v638_v39 }
  0xe9   : > { %v630_v15 = vpop.permute.xlu0 %629 }
  0xea   : > { %v789_v18 = vsel %vm777_vm6, %v1869_v3, %v630_v15 }
  0xeb   : > { %v678_v17 = vpop.permute.xlu1 %677 }
  0xec   : > { %v818_v13 = vsel %vm802_vm7, %v801_v24, %v678_v17 }
  0xed   : > { %v670_v42 = vpop.permute.xlu0 %669 }
  0xee   : > { %v810_v59 = vsel %vm802_vm7, %v789_v18, %v670_v42 }
  0xef   : > { %v697_v21 = vpop.permute.xlu1 %696 }
  0xf0   : > { %v835_v61 = vsel %vm819_vm8, %v818_v13, %v697_v21 }
  0xf1   : > { %v689_v1 = vpop.permute.xlu0 %688 }
  0xf2   : > { %v827_v31 = vsel %vm819_vm8, %v810_v59, %v689_v1 }
  0xf3   : > { %v716_v7 = vpop.permute.xlu1 %715 }
  0xf4   : > { %v852_v32 = vsel %vm836_vm9, %v835_v61, %v716_v7 }
  0xf5   : > { %v708_v19 = vpop.permute.xlu0 %707 }
  0xf6   : > { %v844_v48 = vsel %vm836_vm9, %v827_v31, %v708_v19 }
  0xf7   : > { %v735_v58 = vpop.permute.xlu1 %734 }
  0xf8   : > { %v869_v33 = vsel %vm853_vm10, %v852_v32, %v735_v58 }
  0xf9   : > { %v727_v62 = vpop.permute.xlu0 %726 }
  0xfa   : > { %v861_v3 = vsel %vm853_vm10, %v844_v48, %v727_v62 }
  0xfb   : > { %v754_v4 = vpop.permute.xlu1 %753 }
  0xfc   : > { %v886_v46 = vsel %vm870_vm11, %v869_v33, %v754_v4 }
  0xfd   : > { %v746_v6 = vpop.permute.xlu0 %745 }
  0xfe   : > { %v878_v22 = vsel %vm870_vm11, %v861_v3, %v746_v6 }
  0xff   : > { %v773_v27 = vpop.permute.xlu1 %772 }
 0x100   : > { %v910_v53 = vsel %vm887_vm12, %v886_v46, %v773_v27 }
 0x101   : > { %v765_v34 = vpop.permute.xlu0 %764  ;;  %1104 = vmatmul.mubr.bf16.gmra.mxu1 %v910_v53 }
 0x102   : > { %v898_v9 = vsel %vm887_vm12, %v878_v22, %v765_v34 }
 0x103   : > { %1072 = vmatmul.mubr.bf16.gmra.mxu0 %v898_v9 }
 0x16d   : > { %v1081_v8 = vpop.f32.mrf.mxu1 }
 0x16e   : > { %v1082_v57 = vadd.f32 %v1266_v41, %v1081_v8 }
 0x16f   : > { %v1049_v50 = vpop.f32.mrf.mxu0  ;;  %v1083_v14 = vpop.f32.mrf.mxu1 }
 0x170   : > { %v1050_v10 = vadd.f32 %v1266_v41, %v1049_v50  ;;  %1120 = vst [vmem:[%s2072_s11 + $0x40] sm:$0xff] %v1082_v57 }
 0x171   : > { %v1051_v28 = vpop.f32.mrf.mxu0  ;;  %v1084_v35 = vpop.f32.mrf.mxu1 }
 0x172   : > { %1112 = vst [vmem:[%s2072_s11] sm:$0xff] %v1050_v10  ;;  %v1085_v54 = vadd.f32 %v1266_v41, %v1084_v35 }
 0x173   : > { %v1052_v20 = vpop.f32.mrf.mxu0  ;;  %v1086_v25 = vpop.f32.mrf.mxu1 }
 0x174   : > { %v1053_v29 = vadd.f32 %v1266_v41, %v1052_v20  ;;  %1121 = vst [vmem:[%s2072_s11 + $0x48] sm:$0xff] %v1085_v54 }
 0x175   : > { %v1054_v55 = vpop.f32.mrf.mxu0 }
 0x176   : > { %1113 = vst [vmem:[%s2072_s11 + $0x8] sm:$0xff] %v1053_v29 }
 0x189   : > { %v1089_v49 = vpop.f32.mrf.mxu1 }
 0x18a   : > { %v1090_v45 = vadd.f32 %v1266_v41, %v1089_v49 }
 0x18b   : > { %v1057_v11 = vpop.f32.mrf.mxu0  ;;  %v1091_v12 = vpop.f32.mrf.mxu1 }
 0x18c   : > { %v1058_v37 = vadd.f32 %v1266_v41, %v1057_v11  ;;  %1122 = vst [vmem:[%s2072_s11 + $0x50] sm:$0xff] %v1090_v45 }
 0x18d   : > { %v1059_v63 = vpop.f32.mrf.mxu0  ;;  %v1092_v40 = vpop.f32.mrf.mxu1 }
 0x18e   : > { %1114 = vst [vmem:[%s2072_s11 + $0x10] sm:$0xff] %v1058_v37  ;;  %v1093_v51 = vadd.f32 %v1266_v41, %v1092_v40 }
 0x18f   : > { %v1060_v16 = vpop.f32.mrf.mxu0  ;;  %v1094_v44 = vpop.f32.mrf.mxu1 }
 0x190   : > { %v1061_v52 = vadd.f32 %v1266_v41, %v1060_v16  ;;  %1123 = vst [vmem:[%s2072_s11 + $0x58] sm:$0xff] %v1093_v51 }
 0x191   : > { %v1062_v60 = vpop.f32.mrf.mxu0 }
 0x192   : > { %1115 = vst [vmem:[%s2072_s11 + $0x18] sm:$0xff] %v1061_v52 }
 0x1a5   : > { %v1097_v38 = vpop.f32.mrf.mxu1 }
 0x1a6   : > { %v1098_v43 = vadd.f32 %v1266_v41, %v1097_v38 }
 0x1a7   : > { %v1065_v56 = vpop.f32.mrf.mxu0  ;;  %v1099_v47 = vpop.f32.mrf.mxu1 }
 0x1a8   : > { %v1066_v26 = vadd.f32 %v1266_v41, %v1065_v56  ;;  %1124 = vst [vmem:[%s2072_s11 + $0x60] sm:$0xff] %v1098_v43 }
 0x1a9   : > { %v1067_v5 = vpop.f32.mrf.mxu0  ;;  %v1100_v0 = vpop.f32.mrf.mxu1 }
 0x1aa   : > { %1116 = vst [vmem:[%s2072_s11 + $0x20] sm:$0xff] %v1066_v26  ;;  %v1101_v36 = vadd.f32 %v1266_v41, %v1100_v0 }
 0x1ab   : > { %v1068_v2 = vpop.f32.mrf.mxu0  ;;  %v1102_v23 = vpop.f32.mrf.mxu1 }
 0x1ac   : > { %v1069_v30 = vadd.f32 %v1266_v41, %v1068_v2  ;;  %1125 = vst [vmem:[%s2072_s11 + $0x68] sm:$0xff] %v1101_v36 }
 0x1ad   : > { %v1070_v39 = vpop.f32.mrf.mxu0 }
 0x1ae   : > { %1117 = vst [vmem:[%s2072_s11 + $0x28] sm:$0xff] %v1069_v30 }
 0x1c1   : > { %v1105_v15 = vpop.f32.mrf.mxu1 }
 0x1c2   : > { %v1106_v17 = vadd.f32 %v1266_v41, %v1105_v15 }
 0x1c3   : > { %v1073_v42 = vpop.f32.mrf.mxu0  ;;  %v1107_v21 = vpop.f32.mrf.mxu1 }
 0x1c4   : > { %v1074_v1 = vadd.f32 %v1266_v41, %v1073_v42  ;;  %1126 = vst [vmem:[%s2072_s11 + $0x70] sm:$0xff] %v1106_v17 }
 0x1c5   : > { %v1075_v7 = vpop.f32.mrf.mxu0  ;;  %v1108_v19 = vpop.f32.mrf.mxu1 }
 0x1c6   : > { %1118 = vst [vmem:[%s2072_s11 + $0x30] sm:$0xff] %v1074_v1  ;;  %v1109_v58 = vadd.f32 %v1266_v41, %v1108_v19 }
 0x1c7   : > { %v1076_v62 = vpop.f32.mrf.mxu0  ;;  %v1110_v24 = vpop.f32.mrf.mxu1 }
 0x1c8   : > { %v1077_v13 = vadd.f32 %v1266_v41, %v1076_v62  ;;  %1127 = vst [vmem:[%s2072_s11 + $0x78] sm:$0xff] %v1109_v58 }
 0x1c9   : > { %v1078_v4 = vpop.f32.mrf.mxu0 }
 0x1ca   : > { %1119 = vst [vmem:[%s2072_s11 + $0x38] sm:$0xff] %v1077_v13 }
 0x1cb PF: > { %s13_s16 = sadd.s32 1, %s1411_s16   ;;  %s2113_s12 = smov %s1403_s14 }
 0x1cc   : > { %p10_p7 = scmp.ge.s32.totalorder %s13_s16, 6   ;;  %s2114_s13 = smov %s1407_s15 }
 0x1cd   : > { %s2115_s14 = smov %s2118_s17  ;;  %s2116_s15 = smov %s2122_s18 }
 0x1ce   :  { %12 = sbr.rel (!%p10_p7) target bundleno = 3 (0x3), region = 63 }

</bundles_post_ra>
